<compile_context>
chip_gen: v6e
topology: v6e:2x2x1
jax: 0.10.0
libtpu: 0.0.40
codegen_flags: <defaults>
</compile_context>

<pallas_src>
import math
import functools

import jax
import jax.numpy as jnp
from jax.experimental import pallas as pl
from jax.experimental.pallas import tpu as pltpu


# --------------------------------------------------------------------------
# small helpers
# --------------------------------------------------------------------------
def _round_up(x, mult):
    return ((x + mult - 1) // mult) * mult


def _swoosh_l(x):
    # SwooshLForward: log(1 + exp(x - 4)) - 0.08*x - 0.035; logaddexp reproduces
    # the torch inf-guard in a numerically stable way.
    x_offset = x - 4.0
    return jnp.logaddexp(jnp.zeros_like(x_offset), x_offset) - 0.08 * x - 0.035


def _swoosh_r(x):
    x_offset = x - 1.0
    return jnp.logaddexp(jnp.zeros_like(x_offset), x_offset) - 0.08 * x - 0.313261687


def _apply_activation(x, activation):
    if activation == "SwooshL":
        return _swoosh_l(x)
    if activation == "SwooshR":
        return _swoosh_r(x)
    raise ValueError(f"unsupported activation: {activation}")


def _device_kind():
    try:
        return jax.devices()[0].device_kind.lower()
    except Exception:  # pragma: no cover - non-TPU / odd environments
        return ""


def _vmem_ceiling_and_budget():
    """(vmem_limit ceiling, working-set budget) per TPU generation."""
    kind = _device_kind()
    if "v7" in kind or "7x" in kind:       # 64 MiB physical VMEM per TC
        return 48 << 20, 28 << 20
    if "v4" in kind or "v5" in kind or "v6" in kind:   # 128 MiB physical
        return 100 << 20, 60 << 20
    return 48 << 20, 28 << 20              # unknown: be conservative


def _default_tm():
    kind = _device_kind()
    if "v6" in kind:
        return 512     # v6e: big VMEM, ~650 flop/byte roofline -> large M tiles
    return 256         # v5e / v7x / unknown


def _is_multicore():
    kind = _device_kind()
    return "v7" in kind or "7x" in kind


# --------------------------------------------------------------------------
# kernels
# --------------------------------------------------------------------------
def _resident_kernel(x_ref, wt_ref, *refs, activation, dot_dtype, has_bias):
    # Whole (K, N_pad) weight is VMEM-resident (constant block index across the
    # 1-D M grid), so the activation is computed exactly once per element and
    # the weight is DMA'd from HBM only once.
    if has_bias:
        b_ref, o_ref = refs
    else:
        (o_ref,) = refs
        b_ref = None
    y = _apply_activation(x_ref[...].astype(jnp.float32), activation)   # VPU/EUP, f32
    acc = jnp.dot(y.astype(dot_dtype), wt_ref[...],
                  preferred_element_type=jnp.float32)                   # MXU, f32 acc
    if has_bias:
        acc = acc + b_ref[...]
    o_ref[...] = acc.astype(o_ref.dtype)


def _tiled_kernel(x_ref, wt_ref, *refs, activation, has_bias):
    # N-tiled fallback (weight too large for VMEM).  The activated + cast x
    # tile is cached in a VMEM scratch and reused across all N tiles, so the
    # transcendentals are NOT recomputed per N tile (N axis is "arbitrary").
    if has_bias:
        b_ref, o_ref, y_scratch = refs
    else:
        o_ref, y_scratch = refs
        b_ref = None

    @pl.when(pl.program_id(1) == 0)
    def _():
        y = _apply_activation(x_ref[...].astype(jnp.float32), activation)
        y_scratch[...] = y.astype(y_scratch.dtype)

    acc = jnp.dot(y_scratch[...], wt_ref[...], preferred_element_type=jnp.float32)
    if has_bias:
        acc = acc + b_ref[...]
    o_ref[...] = acc.astype(o_ref.dtype)


# --------------------------------------------------------------------------
# parameter prep (one-time, outside the hot path)
# --------------------------------------------------------------------------
def prepare_params(weight, bias, *, dot_dtype=jnp.bfloat16):
    """weight: (out_channels, in_channels) -> transposed (K, N_pad) in the MXU
    dtype; bias -> f32 (1, N_pad) or None.  N padded to a multiple of 128 for
    lane-dense stores."""
    out_channels, in_channels = weight.shape
    n_pad = _round_up(out_channels, 128)
    wt = weight.T.astype(dot_dtype)                       # (K, N)
    if n_pad != out_channels:
        wt = jnp.pad(wt, ((0, 0), (0, n_pad - out_channels)))
    if bias is None:
        b = None
    else:
        b = bias.astype(jnp.float32).reshape(1, out_channels)
        if n_pad != out_channels:
            b = jnp.pad(b, ((0, 0), (0, n_pad - out_channels)))
    return wt, b, out_channels


# --------------------------------------------------------------------------
# tile / VMEM configuration
# --------------------------------------------------------------------------
def _pick_tn(n_pad, cap=512):
    """Largest multiple of 128 that divides n_pad, capped."""
    best = 128
    t = 256
    while t <= min(n_pad, cap):
        if n_pad % t == 0:
            best = t
        t += 128
    return best


def _select_config(m, k, n_pad, x_bytes, dot_bytes, out_bytes, has_bias,
                   tm_hint, budget):
    m_pad8 = _round_up(max(m, 1), 8)
    tm0 = max(8, min(_round_up(tm_hint, 8), m_pad8))
    # On 2-TC chips make sure the parallel M axis has >= 2 tiles when possible.
    if _is_multicore() and m_pad8 >= 16 and m_pad8 <= tm0:
        tm0 = max(8, _round_up((m_pad8 + 1) // 2, 8))

    def resident_bytes(tm):
        return (2 * k * n_pad * dot_bytes            # weight (counted double-buffered)
                + 2 * tm * k * x_bytes               # x tile double buffer
                + 2 * tm * n_pad * out_bytes         # out tile double buffer
                + ((2 * n_pad * 4) if has_bias else 0))

    def tiled_bytes(tm, tn):
        return (2 * tm * k * x_bytes
                + 2 * k * tn * dot_bytes
                + 2 * tm * tn * out_bytes
                + tm * k * dot_bytes                 # activated-y scratch
                + ((2 * tn * 4) if has_bias else 0))

    # Preferred: whole weight VMEM-resident, 1-D grid over M.
    tm = tm0
    while tm > 8 and resident_bytes(tm) > budget:
        tm = max(8, _round_up(tm // 2, 8))
    if resident_bytes(tm) <= budget:
        return "resident", tm, n_pad, resident_bytes(tm)

    # Fallback: tile N, cache activation across the N axis.
    tn = _pick_tn(n_pad)
    tm = tm0
    while tm > 8 and tiled_bytes(tm, tn) > budget:
        tm = max(8, _round_up(tm // 2, 8))
    if tiled_bytes(tm, tn) > budget and tn > 128:
        tn = 128
        tm = tm0
        while tm > 8 and tiled_bytes(tm, tn) > budget:
            tm = max(8, _round_up(tm // 2, 8))
    return "tiled", tm, tn, tiled_bytes(tm, tn)


# --------------------------------------------------------------------------
# pallas_call wrapper
# --------------------------------------------------------------------------
def _call_kernel(x, wt, b, out_channels, *, activation, tm, out_dtype,
                 vmem_limit_bytes):
    k = x.shape[-1]
    assert wt.shape[0] == k, (wt.shape, x.shape)
    n_pad = wt.shape[1]
    has_bias = b is not None
    out_dtype = x.dtype if out_dtype is None else jnp.dtype(out_dtype)

    lead_shape = x.shape[:-1]
    m = int(math.prod(lead_shape)) if lead_shape else 1
    x2d = x.reshape(m, k)

    ceiling, budget = _vmem_ceiling_and_budget()
    tm_hint = _default_tm() if tm is None else tm
    mode, tm_eff, tn_eff, need_bytes = _select_config(
        m, k, n_pad, x2d.dtype.itemsize, wt.dtype.itemsize,
        out_dtype.itemsize, has_bias, tm_hint, budget)

    m_pad = _round_up(m, tm_eff)
    if m_pad != m:
        # TODO(synk): handle the ragged final M tile with an in-kernel masked
        # store instead of a wrapper-side pad (costs one extra HBM pass on x).
        x2d = jnp.pad(x2d, ((0, m_pad - m), (0, 0)))
    m_tiles = m_pad // tm_eff
    n_tiles = n_pad // tn_eff

    if vmem_limit_bytes is None:
        vmem_limit = int(min(ceiling,
                             max(32 << 20, need_bytes * 3 // 2 + (4 << 20))))
    else:
        vmem_limit = int(vmem_limit_bytes)

    # Advisory cost hint: logaddexp = exp + log1p = 2 transcendentals / element,
    # computed exactly once per element in both paths.
    weight_bytes = wt.size * wt.dtype.itemsize
    bytes_accessed = int(
        x2d.size * x2d.dtype.itemsize
        + (weight_bytes if mode == "resident" else weight_bytes * m_tiles)
        + ((b.size * 4 * (1 if mode == "resident" else m_tiles)) if has_bias else 0)
        + m_pad * n_pad * out_dtype.itemsize)
    cost = pl.CostEstimate(flops=2 * m_pad * k * n_pad,
                           transcendentals=2 * m_pad * k,
                           bytes_accessed=bytes_accessed)

    if mode == "resident":
        kernel = functools.partial(_resident_kernel, activation=activation,
                                   dot_dtype=wt.dtype, has_bias=has_bias)
        in_specs = [pl.BlockSpec((tm_eff, k), lambda i: (i, 0)),
                    pl.BlockSpec((k, n_pad), lambda i: (0, 0))]
        args = [x2d, wt]
        if has_bias:
            in_specs.append(pl.BlockSpec((1, n_pad), lambda i: (0, 0)))
            args.append(b)
        grid_spec = pltpu.PrefetchScalarGridSpec(
            num_scalar_prefetch=0,
            grid=(m_tiles,),
            in_specs=in_specs,
            out_specs=pl.BlockSpec((tm_eff, n_pad), lambda i: (i, 0)),
        )
        dim_sem = ("parallel",)
    else:
        kernel = functools.partial(_tiled_kernel, activation=activation,
                                   has_bias=has_bias)
        in_specs = [pl.BlockSpec((tm_eff, k), lambda i, j: (i, 0)),
                    pl.BlockSpec((k, tn_eff), lambda i, j: (0, j))]
        args = [x2d, wt]
        if has_bias:
            in_specs.append(pl.BlockSpec((1, tn_eff), lambda i, j: (0, j)))
            args.append(b)
        grid_spec = pltpu.PrefetchScalarGridSpec(
            num_scalar_prefetch=0,
            grid=(m_tiles, n_tiles),
            in_specs=in_specs,
            out_specs=pl.BlockSpec((tm_eff, tn_eff), lambda i, j: (i, j)),
            scratch_shapes=[pltpu.VMEM((tm_eff, k), wt.dtype)],
        )
        dim_sem = ("parallel", "arbitrary")

    out2d = pl.pallas_call(
        kernel,
        out_shape=jax.ShapeDtypeStruct((m_pad, n_pad), out_dtype),
        grid_spec=grid_spec,
        compiler_params=pltpu.CompilerParams(
            dimension_semantics=dim_sem,
            vmem_limit_bytes=vmem_limit),
        cost_estimate=cost,
    )(*args)

    if m_pad != m or n_pad != out_channels:
        out2d = out2d[:m, :out_channels]
    return out2d.reshape(*lead_shape, out_channels)


# --------------------------------------------------------------------------
# public API
# --------------------------------------------------------------------------
def make_activation_dropout_and_linear(weight, bias, *, activation="SwooshL",
                                       dropout_p=0.0, dot_dtype=jnp.bfloat16,
                                       tm=None, out_dtype=None,
                                       vmem_limit_bytes=None):
    """Prepare parameters once and return a jitted forward fn x -> out."""
    # TODO(synk): dropout_p != 0.0 (training path) would build the shared-dim
    # mask in-kernel with pltpu.prng_seed + pltpu.prng_random_bits.
    assert float(dropout_p) == 0.0, "only the dropout_p == 0.0 path is implemented"
    wt, b, out_channels = prepare_params(weight, bias, dot_dtype=dot_dtype)

    @jax.jit
    def fwd(x):
        return _call_kernel(x, wt, b, out_channels, activation=activation,
                            tm=tm, out_dtype=out_dtype,
                            vmem_limit_bytes=vmem_limit_bytes)

    return fwd


def activation_dropout_and_linear(x, weight, bias, *, activation="SwooshL",
                                  dropout_p=0.0, dot_dtype=jnp.bfloat16,
                                  tm=None, out_dtype=None, vmem_limit_bytes=None):
    """Convenience one-shot wrapper (prep happens per call; prefer make_...)."""
    assert float(dropout_p) == 0.0, "only the dropout_p == 0.0 path is implemented"
    wt, b, out_channels = prepare_params(weight, bias, dot_dtype=dot_dtype)
    return _call_kernel(x, wt, b, out_channels, activation=activation,
                        tm=tm, out_dtype=out_dtype,
                        vmem_limit_bytes=vmem_limit_bytes)


def init_params(key, in_channels, out_channels, initial_scale=1.0, dtype=jnp.float32):
    """Deterministic init mirroring ScaledLinear (nn.Linear default init * scale)."""
    kw, kb = jax.random.split(key)
    bound = 1.0 / math.sqrt(in_channels)
    weight = jax.random.uniform(kw, (out_channels, in_channels), dtype,
                                minval=-bound, maxval=bound) * initial_scale
    bias = jax.random.uniform(kb, (out_channels,), dtype,
                              minval=-0.1 * initial_scale,
                              maxval=0.1 * initial_scale)
    return weight, bias


# --------------------------------------------------------------------------
# references (bf16 MXU-operand rounding matches the kernel; pure-f32 also given)
# --------------------------------------------------------------------------
def _reference(x, weight, bias, activation="SwooshL", dot_dtype=jnp.bfloat16):
    act = _swoosh_l if activation == "SwooshL" else _swoosh_r
    y = act(x.astype(jnp.float32))
    out = jnp.dot(y.astype(dot_dtype), weight.T.astype(dot_dtype),
                  preferred_element_type=jnp.float32)
    if bias is not None:
        out = out + bias.astype(jnp.float32)
    return out.astype(x.dtype)


def _reference_f32(x, weight, bias, activation="SwooshL"):
    act = _swoosh_l if activation == "SwooshL" else _swoosh_r
    y = act(x.astype(jnp.float32))
    out = y @ weight.T.astype(jnp.float32)
    if bias is not None:
        out = out + bias.astype(jnp.float32)
    return out.astype(x.dtype)


# --------------------------------------------------------------------------
# self-test
# --------------------------------------------------------------------------
if __name__ == "__main__":
    key = jax.random.PRNGKey(0)
    k_x, k_p, k_x2, k_p2, k_x3, k_p3 = jax.random.split(key, 6)

    # Test 1: lane-aligned channel counts, SwooshL, bias (resident-weight path).
    batch, seq, in_c, out_c = 2, 8, 192, 256
    x = jax.random.normal(k_x, (batch, seq, in_c), jnp.float32) * 2.0
    weight, bias = init_params(k_p, in_c, out_c, initial_scale=1.0)

    fwd = make_activation_dropout_and_linear(weight, bias, activation="SwooshL")
    out = jax.block_until_ready(fwd(x))
    assert out.shape == (batch, seq, out_c), out.shape

    ref = _reference(x, weight, bias, "SwooshL")
    err = float(jnp.max(jnp.abs(out - ref)))
    assert jnp.allclose(out, ref, atol=1e-3, rtol=1e-3), err

    ref32 = _reference_f32(x, weight, bias, "SwooshL")
    err32 = float(jnp.max(jnp.abs(out - ref32)))
    assert jnp.allclose(out, ref32, atol=5e-2, rtol=5e-2), err32

    # Test 2: non-multiple-of-128 out_channels and non-multiple-of-8 M, SwooshR
    # (exercises the padding / slicing path).
    x2 = jax.random.normal(k_x2, (3, 5, 96), jnp.float32)
    w2, b2 = init_params(k_p2, 96, 200, initial_scale=0.5)
    out2 = jax.block_until_ready(
        activation_dropout_and_linear(x2, w2, b2, activation="SwooshR"))
    assert out2.shape == (3, 5, 200), out2.shape
    ref2 = _reference(x2, w2, b2, "SwooshR")
    err2 = float(jnp.max(jnp.abs(out2 - ref2)))
    assert jnp.allclose(out2, ref2, atol=1e-3, rtol=1e-3), err2

    # Test 3: bias=None + bf16 output dtype (skips bias DMA, halves write traffic).
    x3 = jax.random.normal(k_x3, (4, 8, 128), jnp.float32)
    w3, _ = init_params(k_p3, 128, 128, initial_scale=1.0)
    out3 = jax.block_until_ready(
        activation_dropout_and_linear(x3, w3, None, activation="SwooshL",
                                      out_dtype=jnp.bfloat16))
    assert out3.shape == (4, 8, 128) and out3.dtype == jnp.bfloat16, (out3.shape, out3.dtype)
    ref3 = _reference(x3, w3, None, "SwooshL").astype(jnp.bfloat16)
    err3 = float(jnp.max(jnp.abs(out3.astype(jnp.float32) - ref3.astype(jnp.float32))))
    assert err3 < 3e-2, err3

    print("KERNEL_OK")
</pallas_src>

<mosaic_0001>
module attributes {stable_mosaic.version = 11 : i64} {
  func.func @_resident_kernel(%arg0: i32, %arg1: memref<16x192xf32, #tpu.memory_space<vmem>>, %arg2: memref<192x256xbf16, #tpu.memory_space<vmem>>, %arg3: memref<1x256xf32, #tpu.memory_space<vmem>>, %arg4: memref<16x256xf32, #tpu.memory_space<vmem>>) attributes {dimension_semantics = [#tpu.dimension_semantics<parallel>], iteration_bounds = array<i64: 1>, scalar_prefetch = 0 : i64, scratch_operands = 0 : i64, tpu.core_type = #tpu.core_type<tc>, window_params = [{transform_indices = @transform_0, window_bounds = array<i64: 16, 192>}, {pipeline_mode = #tpu.pipeline_mode<synchronous>, transform_indices = @transform_1, window_bounds = array<i64: 192, 256>}, {pipeline_mode = #tpu.pipeline_mode<synchronous>, transform_indices = @transform_2, window_bounds = array<i64: 1, 256>}, {transform_indices = @transform_3, window_bounds = array<i64: 16, 256>}]} {
    %c0 = arith.constant 0 : index
    %c0_0 = arith.constant 0 : index
    %0 = vector.load %arg1[%c0, %c0_0] : memref<16x192xf32, #tpu.memory_space<vmem>>, vector<16x192xf32>
    %cst = arith.constant 4.000000e+00 : f32
    %1 = vector.broadcast %cst : f32 to vector<16x192xf32>
    %2 = arith.subf %0, %1 : vector<16x192xf32>
    %cst_1 = arith.constant 0.000000e+00 : f32
    %3 = vector.broadcast %cst_1 : f32 to vector<16x192xf32>
    %4 = arith.maximumf %3, %2 : vector<16x192xf32>
    %5 = arith.subf %3, %2 : vector<16x192xf32>
    %6 = arith.cmpf one, %5, %5 : vector<16x192xf32>
    %7 = arith.addf %3, %2 : vector<16x192xf32>
    %8 = math.absf %5 : vector<16x192xf32>
    %cst_2 = arith.constant 0.000000e+00 : f32
    %9 = vector.broadcast %cst_2 : f32 to vector<16x192xf32>
    %10 = arith.subf %9, %8 : vector<16x192xf32>
    %11 = math.exp %10 : vector<16x192xf32>
    %12 = math.log1p %11 : vector<16x192xf32>
    %13 = arith.addf %4, %12 : vector<16x192xf32>
    %14 = arith.select %6, %7, %13 : vector<16x192xi1>, vector<16x192xf32>
    %cst_3 = arith.constant 8.000000e-02 : f32
    %15 = vector.broadcast %cst_3 : f32 to vector<16x192xf32>
    %16 = arith.mulf %15, %0 : vector<16x192xf32>
    %17 = arith.subf %14, %16 : vector<16x192xf32>
    %cst_4 = arith.constant 3.500000e-02 : f32
    %18 = vector.broadcast %cst_4 : f32 to vector<16x192xf32>
    %19 = arith.subf %17, %18 : vector<16x192xf32>
    %20 = arith.truncf %19 : vector<16x192xf32> to vector<16x192xbf16>
    %c0_5 = arith.constant 0 : index
    %c0_6 = arith.constant 0 : index
    %21 = vector.load %arg2[%c0_5, %c0_6] : memref<192x256xbf16, #tpu.memory_space<vmem>>, vector<192x256xbf16>
    %cst_7 = arith.constant dense<0.000000e+00> : vector<16x256xf32>
    %22 = tpu.matmul %20, %21, %cst_7 {dimension_numbers = #tpu.dot_dimension_numbers<[1], [0], [0], [1], [0, 0, 1, 1], [], []>} : vector<16x192xbf16>, vector<192x256xbf16>, vector<16x256xf32> -> vector<16x256xf32>
    %c0_8 = arith.constant 0 : index
    %c0_9 = arith.constant 0 : index
    %23 = vector.load %arg3[%c0_8, %c0_9] : memref<1x256xf32, #tpu.memory_space<vmem>>, vector<1x256xf32>
    %24 = vector.broadcast %23 : vector<1x256xf32> to vector<16x256xf32>
    %25 = arith.addf %22, %24 : vector<16x256xf32>
    %c0_10 = arith.constant 0 : index
    %c0_11 = arith.constant 0 : index
    %26 = vector.load %arg4[%c0_10, %c0_11] : memref<16x256xf32, #tpu.memory_space<vmem>>, vector<16x256xf32>
    tpu.vector_store %arg4[%c0_10, %c0_11], %25 {strides = array<i32>} : memref<16x256xf32, #tpu.memory_space<vmem>>, vector<16x256xf32>,
    return
  }
  func.func @transform_0(%arg0: i32) -> (i32, i32) {
    %c0_i32 = arith.constant 0 : i32
    %c0_i32_0 = arith.constant 0 : i32
    return %arg0, %c0_i32 : i32, i32
  }
  func.func @transform_1(%arg0: i32) -> (i32, i32) {
    %c0_i32 = arith.constant 0 : i32
    %c0_i32_0 = arith.constant 0 : i32
    %c0_i32_1 = arith.constant 0 : i32
    return %c0_i32, %c0_i32_0 : i32, i32
  }
  func.func @transform_2(%arg0: i32) -> (i32, i32) {
    %c0_i32 = arith.constant 0 : i32
    %c0_i32_0 = arith.constant 0 : i32
    %c0_i32_1 = arith.constant 0 : i32
    return %c0_i32, %c0_i32_0 : i32, i32
  }
  func.func @transform_3(%arg0: i32) -> (i32, i32) {
    %c0_i32 = arith.constant 0 : i32
    %c0_i32_0 = arith.constant 0 : i32
    return %arg0, %c0_i32 : i32, i32
  }
}

</mosaic_0001>

<bundles_post_ra>
// kernel: fwd.1
= control target key start
LH: loop header
LB: loop body
LE: loop exit
PB: predicated region body
PF: predicated region fallthrough
CT: control target
= control target key end

     0   :  { %8 = vsyncpa [#allocation3], 0  ;;  %s644_s0 = inlined_call_operand.hbm [shape: f32[16,192], index: 0, kind: input, shape index: {}]   ;;  %s645_s1 = inlined_call_operand.hbm [shape: bf16[192,256], index: 1, kind: input, shape index: {}]   ;;  %s646_s2 = inlined_call_operand.vmem [shape: f32[1,256], index: 2, kind: input, shape index: {}]   ;;  %s647_s3 = inlined_call_operand.hbm [shape: f32[16,256], index: 3, kind: output, shape index: {}]  }
   0x1   :  { %9 = vsyncpa [#allocation6], 0 }
   0x2   :  { %10 = vsyncpa [#allocation4], 0  ;;  %s525_s12 = smov [#allocation2]  }
   0x3   :  { %s16_s13 = sshll.u32 %s525_s12, 4  ;;  %s17_s13 = int_to_ptr.vmem [resolvable:$true] %s16_s13 }
   0x4   :  { %s467_s14 = scalar_lea.vmem %s17_s13, 512  ;;  %p472_p1 = scmp.lt.s32.totalorder %s17_s13, %s17_s13 }
   0x5   :  { %p468_p0 = scmp.ne.s32.totalorder %s17_s13, %s467_s14  ;;  %p473_p2 = scmp.lt.s32.totalorder %s467_s14, %s467_s14 }
   0x7   :  { %p474_p3 = por %p473_p2, %p472_p1 }
   0x9   :  { %p475_p4 = pnand %p474_p3, %p468_p0 }
   0xb   :  { %478 = shalt.err (!%p475_p4)
}
   0xc   :  { %s526_s15 = smov 256   ;;  %s527_s16 = smov 16  }
   0xd   :  { %22 = dma.hbm_to_vmem [thread:$0]  %s644_s0, 512, %s17_s13, [#allocation3], %s526_s15, %s526_s15, %s527_s16  }
   0xe   :  { %s528_s19 = smov [#allocation5]  }
   0xf   :  { %s28_s20 = sshll.u32 %s528_s19, 4  ;;  %s29_s20 = int_to_ptr.vmem [resolvable:$true] %s28_s20 }
  0x10   :  { %s487_s21 = scalar_lea.vmem %s29_s20, 3072  ;;  %p492_p6 = scmp.lt.s32.totalorder %s29_s20, %s29_s20 }
  0x11   :  { %p488_p5 = scmp.ne.s32.totalorder %s29_s20, %s487_s21  ;;  %p493_p7 = scmp.lt.s32.totalorder %s487_s21, %s487_s21 }
  0x13   :  { %p494_p8 = por %p493_p7, %p492_p6 }
  0x15   :  { %p495_p9 = pnand %p494_p8, %p488_p5 }
  0x17   :  { %498 = shalt.err (!%p495_p9)
}
  0x18   :  { %s529_s22 = smov 128   ;;  %s530_s23 = smov 8  }
  0x19   :  { %34 = dma.hbm_to_vmem [thread:$0]  %s645_s1, 3072, %s29_s20, [#allocation6], %s529_s22, %s529_s22, %s530_s23  }
  0x1a   :  { %519 = dma.done.wait [#allocation3], 512  }
  0x1b   :  { %520 = vsyncadd [#allocation3], 4294966784 }
  0x1c   :  { %521 = dma.done.wait [#allocation6], 3072  }
  0x1d   :  { %522 = vsyncadd [#allocation6], 4294964224  ;;  %v407_v0 = vld [vmem:[#allocation5 + $0x74] ss:$8 sps:$4 sm:$0xff]   ;;  %v409_v1 = vld [vmem:[#allocation5 + $0x70] ss:$8 sps:$4 sm:$0xff]  }
  0x1e   :  { %302 = vmatprep.subr.bf16.mxu0 %v407_v0  ;;  %v410_v2 = vld [vmem:[#allocation5 + $0x64] ss:$8 sps:$4 sm:$0xff]   ;;  %v412_v3 = vld [vmem:[#allocation5 + $0x60] ss:$8 sps:$4 sm:$0xff]   ;;  %v413_v4 = vld [vmem:[#allocation5 + $0x54] ss:$8 sps:$4 sm:$0xff]  }
  0x1f   :  { %303 = vmatpush1.bf16.msra.mxu0 %v409_v1  ;;  %v415_v5 = vld [vmem:[#allocation5 + $0x50] ss:$8 sps:$4 sm:$0xff]   ;;  %v416_v6 = vld [vmem:[#allocation5 + $0x44] ss:$8 sps:$4 sm:$0xff]   ;;  %v418_v7 = vld [vmem:[#allocation5 + $0x40] ss:$8 sps:$4 sm:$0xff]  }
  0x20   :  { %304 = vmatprep.subr.bf16.mxu0 %v410_v2  ;;  %v419_v8 = vld [vmem:[#allocation5 + $0x34] ss:$8 sps:$4 sm:$0xff]   ;;  %v421_v9 = vld [vmem:[#allocation5 + $0x30] ss:$8 sps:$4 sm:$0xff]   ;;  %v422_v10 = vld [vmem:[#allocation5 + $0x24] ss:$8 sps:$4 sm:$0xff]  }
  0x21   :  { %v561_v11 = vld [vmem:[#allocation2 + $0x8] sm:$0xff]  ;;  %v563_v12 = vld [vmem:[#allocation2 + $0x18] sm:$0xff]  ;;  %v565_v13 = vld [vmem:[#allocation2] sm:$0xff]  ;;  %vm298_vm8 = vcmask 523264   ;;  %s531_s26 = smov [#allocation7]  }
  0x22   :  { %v568_v14 = vadd.f32 -4.0, %v561_v11  ;;  %v571_v15 = vadd.f32 -4.0, %v563_v12  ;;  %v573_v16 = vld [vmem:[#allocation2 + $0x10] sm:$0xff]  ;;  %v576_v17 = vadd.f32 -4.0, %v565_v13  ;;  %v424_v18 = vld [vmem:[#allocation5 + $0x20] ss:$8 sps:$4 sm:$0xff]  }
  0x23   :  { %305 = vmatpush1.bf16.msra.mxu0 %v412_v3  ;;  %v425_v21 = vld [vmem:[#allocation5 + $0x14] ss:$8 sps:$4 sm:$0xff]   ;;  %v585_v22 = vadd.f32 -4.0, %v573_v16  ;;  %v427_v28 = vld [vmem:[#allocation5 + $0x10] ss:$8 sps:$4 sm:$0xff]   ;;  %s354_s27 = sshll.u32 %s531_s26, 4  ;;  %s355_s27 = int_to_ptr.vmem [resolvable:$true] %s354_s27 }
  0x24   :  { %306 = vmatprep.subr.bf16.mxu0 %v413_v4  ;;  %v579_v19 = vsub.f32 0.0, %v568_v14  ;;  %v582_v20 = vsub.f32 0.0, %v571_v15  ;;  %v588_v23 = vsub.f32 0.0, %v576_v17  ;;  %v428_v31 = vld [vmem:[#allocation5 + $0x4] ss:$8 sps:$4 sm:$0xff]   ;;  %s499_s28 = scalar_lea.vmem %s355_s27, 512  ;;  %p504_p11 = scmp.lt.s32.totalorder %s355_s27, %s355_s27 }
  0x25   :  { %v593_v26 = vsub.f32 0.0, %v585_v22  ;;  %v430_v38 = vld [vmem:[#allocation5] ss:$8 sps:$4 sm:$0xff]   ;;  %v431_v39 = vld [vmem:[#allocation5 + $0xb4] ss:$8 sps:$4 sm:$0xff]   ;;  %p500_p10 = scmp.ne.s32.totalorder %s355_s27, %s499_s28  ;;  %p505_p12 = scmp.lt.s32.totalorder %s499_s28, %s499_s28 }
  0x26   :  { %v69_v24 = vand.u32 2147483647, %v579_v19  ;;  %v71_v25 = vand.u32 2147483647, %v582_v20  ;;  %v68_v27 = vand.u32 2147483647, %v588_v23  ;;  %vm61_vm2 = vcmp.ne.f32.partialorder %v579_v19, %v579_v19 }
  0x27   :  { %307 = vmatpush1.bf16.msra.mxu0 %v415_v5  ;;  %v70_v32 = vand.u32 2147483647, %v593_v26  ;;  %v433_v41 = vld [vmem:[#allocation5 + $0xb0] ss:$8 sps:$4 sm:$0xff]   ;;  %v434_v42 = vld [vmem:[#allocation5 + $0xa4] ss:$8 sps:$4 sm:$0xff]   ;;  %vm63_vm4 = vcmp.ne.f32.partialorder %v582_v20, %v582_v20  ;;  %vm60_vm6 = vcmp.ne.f32.partialorder %v588_v23, %v588_v23  ;;  %vm62_vm7 = vcmp.ne.f32.partialorder %v593_v26, %v593_v26  ;;  %p506_p13 = por %p505_p12, %p504_p11 }
  0x28   :  { %308 = vmatprep.subr.bf16.mxu0 %v416_v6  ;;  %v73_v29 = vsub.f32 0.0, %v69_v24  ;;  %v75_v30 = vsub.f32 0.0, %v71_v25  ;;  %v72_v33 = vsub.f32 0.0, %v68_v27  ;;  %v436_v43 = vld [vmem:[#allocation5 + $0xa0] ss:$8 sps:$4 sm:$0xff]   ;;  %v55_v24 = vmax.f32 %v571_v15, 0.0 }
  0x29   :  { %v74_v36 = vsub.f32 0.0, %v70_v32  ;;  %v437_v44 = vld [vmem:[#allocation5 + $0x94] ss:$8 sps:$4 sm:$0xff]   ;;  %v439_v45 = vld [vmem:[#allocation5 + $0x90] ss:$8 sps:$4 sm:$0xff]   ;;  %p507_p0 = pnand %p506_p13, %p500_p10 }
  0x2a   :  { %v78_v34 = vmul.f32 1.442695, %v73_v29  ;;  %v82_v35 = vmul.f32 1.442695, %v75_v30  ;;  %v76_v37 = vmul.f32 1.442695, %v72_v33 }
  0x2b   :  { %309 = vmatpush1.bf16.msra.mxu0 %v418_v7  ;;  %v80_v40 = vmul.f32 1.442695, %v74_v36  ;;  %v440_v47 = vld [vmem:[#allocation5 + $0x84] ss:$8 sps:$4 sm:$0xff]   ;;  %v442_v53 = vld [vmem:[#allocation5 + $0x80] ss:$8 sps:$4 sm:$0xff]  }
  0x2c   :  { %310 = vmatprep.subr.bf16.mxu0 %v419_v8  ;;  %443 = vpow2.f32 %v78_v34  ;;  %v129_v1 = vmul.f32 0.08, %v561_v11  ;;  %v131_v4 = vmul.f32 0.08, %v563_v12  ;;  %v128_v6 = vmul.f32 0.08, %v565_v13 }
  0x2d   :  { %445 = vpow2.f32 %v82_v35  ;;  %v53_v8 = vmax.f32 %v568_v14, 0.0  ;;  %v54_v35 = vmax.f32 %v585_v22, 0.0 }
  0x2e   :  { %447 = vpow2.f32 %v76_v37 }
  0x2f   :  { %311 = vmatpush1.bf16.msra.mxu0 %v421_v9  ;;  %449 = vpow2.f32 %v80_v40 }
  0x30   :  { %312 = vmatprep.subr.bf16.mxu0 %v422_v10 }
  0x33   :  { %313 = vmatpush1.bf16.msra.mxu0 %v424_v18 }
  0x34   :  { %314 = vmatprep.subr.bf16.mxu0 %v425_v21 }
  0x37   :  { %315 = vmatpush1.bf16.msra.mxu0 %v427_v28  ;;  %v52_v28 = vmax.f32 %v576_v17, 0.0 }
  0x38   :  { %316 = vmatprep.subr.bf16.mxu0 %v428_v31 }
  0x39   :  { %v444_v46 = vpop.eup %443 }
  0x3a   :  { %v446_v48 = vpop.eup %445  ;;  %v93_v49 = vadd.f32 1.0, %v444_v46  ;;  %v96_v56 = vmul.f32 -0.5, %v444_v46  ;;  %v99_v61 = vand.u32 2147483647, %v444_v46 }
  0x3b   :  { %317 = vmatpush1.bf16.msra.mxu0 %v430_v38  ;;  %v448_v50 = vpop.eup %447  ;;  %v111_v51 = vadd.f32 1.0, %v446_v48  ;;  %v114_v57 = vmul.f32 -0.5, %v446_v48  ;;  %v117_v63 = vand.u32 2147483647, %v446_v48 }
  0x3c   :  { %326 = vmatprep.subr.bf16.mxu0 %v431_v39  ;;  %v450_v52 = vpop.eup %449  ;;  %451 = vlog2.f32 %v93_v49  ;;  %v84_v54 = vadd.f32 1.0, %v448_v50  ;;  %v87_v58 = vmul.f32 -0.5, %v448_v50  ;;  %v97_v59 = vadd.f32 1.0, %v96_v56 }
  0x3d   :  { %453 = vlog2.f32 %v111_v51  ;;  %v102_v55 = vadd.f32 1.0, %v450_v52  ;;  %v105_v60 = vmul.f32 -0.5, %v450_v52  ;;  %v115_v62 = vadd.f32 1.0, %v114_v57 }
  0x3e   :  { %455 = vlog2.f32 %v84_v54  ;;  %v88_v0 = vadd.f32 1.0, %v87_v58  ;;  %v90_v2 = vand.u32 2147483647, %v448_v50  ;;  %v98_v3 = vmul.f32 %v444_v46, %v97_v59 }
  0x3f   :  { %327 = vmatpush2.bf16.msra.mxu0 %v433_v41  ;;  %457 = vlog2.f32 %v102_v55  ;;  %v106_v5 = vadd.f32 1.0, %v105_v60  ;;  %vm601_vm0 = vcmp.lt.f32.partialorder %v99_v61, 0.0004427343  ;;  %v116_v10 = vmul.f32 %v446_v48, %v115_v62 }
  0x40   :  { %328 = vmatprep.subr.bf16.mxu0 %v434_v42  ;;  %v108_v18 = vand.u32 2147483647, %v450_v52  ;;  %vm606_vm1 = vcmp.lt.f32.partialorder %v117_v63, 0.0004427343  ;;  %v89_v12 = vmul.f32 %v448_v50, %v88_v0  ;;  %vm91_vm3 = vcmp.lt.f32.partialorder %v90_v2, 0.0004427343 }
  0x41   :  { %v107_v31 = vmul.f32 %v450_v52, %v106_v5  ;;  %v130_v41 = vmul.f32 0.08, %v573_v16  ;;  %v168_v51 = vlaneseq }
  0x42   :  { %vm109_vm5 = vcmp.lt.f32.partialorder %v108_v18, 0.0004427343 }
  0x43   :  { %329 = vmatpush2.bf16.msra.mxu0 %v436_v43  ;;  %v169_v26 = vshrl.u32 %v168_v51, 7 }
  0x44   :  { %330 = vmatprep.subr.bf16.mxu0 %v437_v44 }
  0x45   :  { %v170_v52 = vsub.s32 0, %v169_v26 }
  0x47   :  { %331 = vmatpush2.bf16.msra.mxu0 %v439_v45 }
  0x48   :  { %332 = vmatprep.subr.bf16.mxu0 %v440_v47 }
  0x49   :  { %v452_v7 = vpop.eup %451 }
  0x4a   :  { %v454_v21 = vpop.eup %453  ;;  %v95_v11 = vmul.f32 0.6931472, %v452_v7 }
  0x4b   :  { %333 = vmatpush2.bf16.msra.mxu0 %v442_v53  ;;  %v456_v27 = vpop.eup %455  ;;  %v113_v13 = vmul.f32 0.6931472, %v454_v21  ;;  %v174_v53 = vsub.s32 1, %v169_v26 }
  0x4c   :  { %v101_v29 = vsel %vm601_vm0, %v98_v3, %v95_v11  ;;  %v86_v30 = vmul.f32 0.6931472, %v456_v27  ;;  %v458_v32 = vpop.eup %457 }
  0x4d   :  { %v119_v33 = vsel %vm606_vm1, %v116_v10, %v113_v13  ;;  %v121_v34 = vadd.f32 %v101_v29, %v53_v8  ;;  %v104_v38 = vmul.f32 0.6931472, %v458_v32 }
  0x4e   :  { %v123_v36 = vadd.f32 %v119_v33, %v55_v24  ;;  %v92_v37 = vsel %vm91_vm3, %v89_v12, %v86_v30 }
  0x4f   :  { %v125_v39 = vsel %vm61_vm2, %v568_v14, %v121_v34  ;;  %v120_v40 = vadd.f32 %v92_v37, %v52_v28  ;;  %v110_v23 = vsel %vm109_vm5, %v107_v31, %v104_v38 }
  0x50   :  { %v127_v42 = vsel %vm63_vm4, %v571_v15, %v123_v36  ;;  %v133_v43 = vsub.f32 %v125_v39, %v129_v1  ;;  %v122_v45 = vadd.f32 %v110_v23, %v54_v35 }
  0x51   :  { %v135_v44 = vsub.f32 %v127_v42, %v131_v4  ;;  %v124_v46 = vsel %vm60_vm6, %v576_v17, %v120_v40  ;;  %v166_v17 = vld [vmem:[%s646_s2] sm:$0x3] }
  0x52   :  { %v372_v47 = vadd.f32 -0.035, %v133_v43  ;;  %v132_v19 = vsub.f32 %v124_v46, %v128_v6  ;;  %v126_v48 = vsel %vm62_vm7, %v585_v22, %v122_v45  ;;  %v171_v54 = vrot.slane %v166_v17, %v170_v52 }
  0x53   :  { %v374_v14 = vadd.f32 -0.035, %v135_v44  ;;  %v134_v16 = vsub.f32 %v126_v48, %v130_v41  ;;  %v175_v55 = vrot.slane %v166_v17, %v174_v53 }
  0x54   :  { %v371_v49 = vadd.f32 -0.035, %v132_v19 }
  0x55   :  { %v141_v50 = vpack.c.bf16 %v374_v14, %v372_v47  ;;  %v373_v20 = vadd.f32 -0.035, %v134_v16 }
  0x57   :  { %399 = vmatprep.mubr.msk.bf16.mxu0 %vm298_vm8, %v141_v50  ;;  %v140_v15 = vpack.c.bf16 %v373_v20, %v371_v49 }
  0x59   :  { %335 = vmatmul.mubr.bf16.vlgmr.msra.gmra.mxu0 %v140_v15 }
 0x119   :  { %v336_v56 = vpop.f32.mrf.mxu0 }
 0x11a   :  { %v337_v22 = vadd.f32 %v336_v56, %v171_v54 }
 0x11b   :  { %v338_v57 = vpop.f32.mrf.mxu0 }
 0x11c   :  { %345 = vst [vmem:[#allocation7] sm:$0xff] %v337_v22  ;;  %v339_v58 = vadd.f32 %v338_v57, %v175_v55 }
 0x11d   :  { %v340_v59 = vpop.f32.mrf.mxu0 }
 0x11e   :  { %346 = vst [vmem:[#allocation7 + $0x8] sm:$0xff] %v339_v58  ;;  %v341_v60 = vadd.f32 %v340_v59, %v171_v54 }
 0x11f   :  { %v342_v61 = vpop.f32.mrf.mxu0 }
 0x120   :  { %347 = vst [vmem:[#allocation7 + $0x10] sm:$0xff] %v341_v60  ;;  %v343_v62 = vadd.f32 %v342_v61, %v175_v55 }
 0x122   :  { %348 = vst [vmem:[#allocation7 + $0x18] sm:$0xff] %v343_v62 }
 0x123   :  { %510 = shalt.err (!%p507_p0)
}
 0x124   :  { %360 = dma.vmem_to_hbm [thread:$0]  %s355_s27, 512, %s647_s3, [#allocation4], %s526_s15, %s526_s15, %s527_s16  }
 0x125   :  { %523 = dma.done.wait [#allocation4], 512  }
 0x126   :  { %524 = vsyncadd [#allocation4], 4294966784 }
 0x127   :  { %364 = vsyncpa [#allocation3], 1 }
 0x128   :  { %365 = vsyncpa [#allocation6], 1 }
 0x129   :  { %366 = vsyncpa [#allocation4], 1 }

</bundles_post_ra>
